<compile_context>
chip_gen: v7x
topology: tpu7x:2x2x1
jax: 0.10.0
libtpu: 0.0.40
codegen_flags: <defaults>
</compile_context>

<pallas_src>
import functools

import jax
import jax.numpy as jnp
from jax.experimental import pallas as pl
from jax.experimental.pallas import tpu as pltpu

n_hidden = 32
_LANE = 128


def _round_up(x, m):
    return (x + m - 1) // m * m


def _mlp_kernel(x_ref, w_ref, o_ref, *, n_input, full_k, bias_row, n_out):
    # x_ref : (tile, n_input)                    -- advances with the grid
    # w_ref : (3, bias_row + 8, full_k) slab     -- slot i rows [0:full_k) = Wi
    #                                               (zero-padded), row bias_row = bi
    # o_ref : (tile, n_out)                      -- narrow, un-padded output block
    x = x_ref[...]

    # Row slices are 8-aligned sub-blocks; no lane slicing anywhere.
    w1 = w_ref[0, :n_input, :]                    # (n_input, full_k)
    w2 = w_ref[1, :full_k, :]                     # (full_k,  full_k)
    w3 = w_ref[2, :full_k, :]                     # (full_k,  full_k)
    b1 = w_ref[0, bias_row:bias_row + 1, :]       # (1, full_k)
    b2 = w_ref[1, bias_row:bias_row + 1, :]
    b3 = w_ref[2, bias_row:bias_row + 1, :]

    # Padded columns of W/b are zero -> padded activation lanes stay exactly 0
    # through bias + ReLU, so contracting over the full padded K is exact.
    h1 = jnp.maximum(jnp.dot(x, w1, preferred_element_type=jnp.float32) + b1, 0.0)
    h2 = jnp.maximum(jnp.dot(h1, w2, preferred_element_type=jnp.float32) + b2, 0.0)
    logits = jnp.dot(h2, w3, preferred_element_type=jnp.float32) + b3
    o_ref[...] = logits[:, :n_out].astype(o_ref.dtype)


def pack_params(params):
    """Pack W1/W2/W3 and b1/b2/b3 into ONE zero-padded (3, R, C) slab.

    Slot i: rows [0:full_k) hold Wi (zero-padded to full 128x128 alignment),
    row `bias_row` holds bi (zero-padded); everything else is zero.
    """
    w1, b1 = params["W1"], params["b1"]
    w2, b2 = params["W2"], params["b2"]
    w3, b3 = params["W3"], params["b3"]
    n_input, n_hid = w1.shape
    n_out = w3.shape[1]

    # Lane dim and padded contraction dim (>= 128, lane-dense, fully aligned).
    full_k = _round_up(max(n_hid, n_out), _LANE)
    # Weight row block: big enough for W1's n_input rows and the padded K.
    rows = max(_round_up(n_input, 8), full_k)
    bias_row = rows
    total_rows = rows + 8                         # one extra 8-row block for bias

    def pack_one(w, b):
        r, c = w.shape
        slab = jnp.zeros((total_rows, full_k), jnp.float32)
        slab = slab.at[:r, :c].set(w.astype(jnp.float32))
        slab = slab.at[bias_row, :c].set(b.reshape(-1).astype(jnp.float32))
        return slab

    w_slab = jnp.stack([pack_one(w1, b1), pack_one(w2, b2), pack_one(w3, b3)])
    return w_slab, (n_input, n_hid, n_out, full_k, bias_row)


def generic_network_forward(x, params, *, block_rows=1024):
    """x: (batch, n_input) f32.  params: dict of W1,b1,W2,b2,W3,b3."""
    w_slab, (n_input, n_hid, n_out, full_k, bias_row) = pack_params(params)
    batch = x.shape[0]

    # Row tile: sublane aligned, default 1024 rows (overhead-bound kernel ->
    # bigger tiles amortize the ~0.35us per-step cost; still ~1 MiB of VMEM).
    block_rows = max(8, _round_up(block_rows, 8))
    tile = min(block_rows, _round_up(batch, 8))
    # v7x megacore: ensure >= 2 parallel grid steps for larger batches so the
    # second TensorCore gets work (no-op on v5e/v6e, which have 1 TC).
    if batch > 512 and _round_up(batch, tile) // tile < 2:
        tile = _round_up((tile + 1) // 2, 8)
    padded_batch = _round_up(batch, tile)
    if padded_batch != batch:
        # TODO(synk): ragged last tile could be handled with a masked store to
        # avoid this extra pad copy of x; it is tiny (x is narrow).
        x = jnp.pad(x, ((0, padded_batch - batch), (0, 0)))

    kernel = functools.partial(
        _mlp_kernel, n_input=n_input, full_k=full_k, bias_row=bias_row, n_out=n_out
    )

    out = pl.pallas_call(
        kernel,
        out_shape=jax.ShapeDtypeStruct((padded_batch, n_out), jnp.float32),
        grid_spec=pltpu.PrefetchScalarGridSpec(
            num_scalar_prefetch=0,
            grid=(padded_batch // tile,),
            in_specs=[
                # x tile advances with the grid.
                pl.BlockSpec((tile, n_input), lambda i: (i, 0)),
                # Weight+bias slab: constant block index -> DMA'd once,
                # VMEM-resident for the whole call (~200 KiB).
                pl.BlockSpec(w_slab.shape, lambda i: (0, 0, 0)),
            ],
            # Narrow output block: last dim equals full array dim (n_out), so
            # HBM writeback is ~32x smaller than a 128-lane padded output.
            out_specs=pl.BlockSpec((tile, n_out), lambda i: (i, 0)),
        ),
        compiler_params=pltpu.CompilerParams(
            # Independent batch axis -> 2 TensorCores split the grid on v7x.
            dimension_semantics=("parallel",),
        ),
    )(x, w_slab)

    return out if padded_batch == batch else out[:batch]


def init_params(key, n_input, n_hid, n_output):
    """Deterministic init mimicking PyTorch nn.Linear (uniform +/- 1/sqrt(fan_in))."""
    ks = jax.random.split(key, 6)

    def lin(kw, kb, fan_in, fan_out):
        bound = 1.0 / jnp.sqrt(fan_in)
        w = jax.random.uniform(kw, (fan_in, fan_out), jnp.float32, -bound, bound)
        b = jax.random.uniform(kb, (1, fan_out), jnp.float32, -bound, bound)
        return w, b

    w1, b1 = lin(ks[0], ks[1], n_input, n_hid)
    w2, b2 = lin(ks[2], ks[3], n_hid, n_hid)
    w3, b3 = lin(ks[4], ks[5], n_hid, n_output)
    return {"W1": w1, "b1": b1, "W2": w2, "b2": b2, "W3": w3, "b3": b3}


def _reference(x, params):
    h1 = jnp.maximum(x @ params["W1"] + params["b1"], 0.0)
    h2 = jnp.maximum(h1 @ params["W2"] + params["b2"], 0.0)
    return h2 @ params["W3"] + params["b3"]


if __name__ == "__main__":
    key = jax.random.PRNGKey(0)
    k_x, k_x2, k_x3, k_p = jax.random.split(key, 4)

    batch, n_input, n_output = 8, 16, 4
    params = init_params(k_p, n_input, n_hidden, n_output)

    # Small example input (single grid step, batch rounded to 8).
    x = jax.random.normal(k_x, (batch, n_input), dtype=jnp.float32)
    logits = generic_network_forward(x, params)
    jax.block_until_ready(logits)
    assert logits.shape == (batch, n_output)
    assert jnp.allclose(logits, _reference(x, params), atol=1e-4, rtol=1e-4)

    # Batch that needs row padding (single grid step).
    x2 = jax.random.normal(k_x2, (300, n_input), dtype=jnp.float32)
    logits2 = generic_network_forward(x2, params)
    jax.block_until_ready(logits2)
    assert logits2.shape == (300, n_output)
    assert jnp.allclose(logits2, _reference(x2, params), atol=1e-4, rtol=1e-4)

    # Large batch exercising the megacore split (>= 2 parallel grid steps).
    x3 = jax.random.normal(k_x3, (1000, n_input), dtype=jnp.float32)
    logits3 = generic_network_forward(x3, params)
    jax.block_until_ready(logits3)
    assert logits3.shape == (1000, n_output)
    assert jnp.allclose(logits3, _reference(x3, params), atol=1e-4, rtol=1e-4)

    print("KERNEL_OK")
</pallas_src>

<mosaic_0001>
module attributes {stable_mosaic.version = 11 : i64} {
  func.func @_mlp_kernel(%arg0: i32, %arg1: memref<8x16xf32, #tpu.memory_space<vmem>>, %arg2: memref<3x136x128xf32, #tpu.memory_space<vmem>>, %arg3: memref<8x4xf32, #tpu.memory_space<vmem>>) attributes {dimension_semantics = [#tpu.dimension_semantics<parallel>], iteration_bounds = array<i64: 1>, scalar_prefetch = 0 : i64, scratch_operands = 0 : i64, tpu.core_type = #tpu.core_type<tc>, window_params = [{transform_indices = @transform_0, window_bounds = array<i64: 8, 16>}, {pipeline_mode = #tpu.pipeline_mode<synchronous>, transform_indices = @transform_1, window_bounds = array<i64: 3, 136, 128>}, {transform_indices = @transform_2, window_bounds = array<i64: 8, 4>}]} {
    %c0 = arith.constant 0 : index
    %c0_0 = arith.constant 0 : index
    %0 = vector.load %arg1[%c0, %c0_0] : memref<8x16xf32, #tpu.memory_space<vmem>>, vector<8x16xf32>
    %c0_1 = arith.constant 0 : index
    %c0_2 = arith.constant 0 : index
    %c0_3 = arith.constant 0 : index
    %1 = vector.load %arg2[%c0_1, %c0_2, %c0_3] : memref<3x136x128xf32, #tpu.memory_space<vmem>>, vector<1x16x128xf32>
    %2 = vector.shape_cast %1 : vector<1x16x128xf32> to vector<16x128xf32>
    %c1 = arith.constant 1 : index
    %c0_4 = arith.constant 0 : index
    %c0_5 = arith.constant 0 : index
    %3 = vector.load %arg2[%c1, %c0_4, %c0_5] : memref<3x136x128xf32, #tpu.memory_space<vmem>>, vector<1x128x128xf32>
    %4 = vector.shape_cast %3 : vector<1x128x128xf32> to vector<128x128xf32>
    %c2 = arith.constant 2 : index
    %c0_6 = arith.constant 0 : index
    %c0_7 = arith.constant 0 : index
    %5 = vector.load %arg2[%c2, %c0_6, %c0_7] : memref<3x136x128xf32, #tpu.memory_space<vmem>>, vector<1x128x128xf32>
    %6 = vector.shape_cast %5 : vector<1x128x128xf32> to vector<128x128xf32>
    %c0_8 = arith.constant 0 : index
    %c128 = arith.constant 128 : index
    %c0_9 = arith.constant 0 : index
    %7 = vector.load %arg2[%c0_8, %c128, %c0_9] : memref<3x136x128xf32, #tpu.memory_space<vmem>>, vector<1x1x128xf32>
    %8 = vector.shape_cast %7 : vector<1x1x128xf32> to vector<1x128xf32>
    %c1_10 = arith.constant 1 : index
    %c128_11 = arith.constant 128 : index
    %c0_12 = arith.constant 0 : index
    %9 = vector.load %arg2[%c1_10, %c128_11, %c0_12] : memref<3x136x128xf32, #tpu.memory_space<vmem>>, vector<1x1x128xf32>
    %10 = vector.shape_cast %9 : vector<1x1x128xf32> to vector<1x128xf32>
    %c2_13 = arith.constant 2 : index
    %c128_14 = arith.constant 128 : index
    %c0_15 = arith.constant 0 : index
    %11 = vector.load %arg2[%c2_13, %c128_14, %c0_15] : memref<3x136x128xf32, #tpu.memory_space<vmem>>, vector<1x1x128xf32>
    %12 = vector.shape_cast %11 : vector<1x1x128xf32> to vector<1x128xf32>
    %cst = arith.constant dense<0.000000e+00> : vector<8x128xf32>
    %13 = tpu.matmul %0, %2, %cst {dimension_numbers = #tpu.dot_dimension_numbers<[1], [0], [0], [1], [0, 0, 1, 1], [], []>} : vector<8x16xf32>, vector<16x128xf32>, vector<8x128xf32> -> vector<8x128xf32>
    %14 = vector.broadcast %8 : vector<1x128xf32> to vector<8x128xf32>
    %15 = arith.addf %13, %14 : vector<8x128xf32>
    %cst_16 = arith.constant 0.000000e+00 : f32
    %16 = vector.broadcast %cst_16 : f32 to vector<8x128xf32>
    %17 = arith.maximumf %15, %16 : vector<8x128xf32>
    %cst_17 = arith.constant dense<0.000000e+00> : vector<8x128xf32>
    %18 = tpu.matmul %17, %4, %cst_17 {dimension_numbers = #tpu.dot_dimension_numbers<[1], [0], [0], [1], [0, 0, 1, 1], [], []>} : vector<8x128xf32>, vector<128x128xf32>, vector<8x128xf32> -> vector<8x128xf32>
    %19 = vector.broadcast %10 : vector<1x128xf32> to vector<8x128xf32>
    %20 = arith.addf %18, %19 : vector<8x128xf32>
    %cst_18 = arith.constant 0.000000e+00 : f32
    %21 = vector.broadcast %cst_18 : f32 to vector<8x128xf32>
    %22 = arith.maximumf %20, %21 : vector<8x128xf32>
    %cst_19 = arith.constant dense<0.000000e+00> : vector<8x128xf32>
    %23 = tpu.matmul %22, %6, %cst_19 {dimension_numbers = #tpu.dot_dimension_numbers<[1], [0], [0], [1], [0, 0, 1, 1], [], []>} : vector<8x128xf32>, vector<128x128xf32>, vector<8x128xf32> -> vector<8x128xf32>
    %24 = vector.broadcast %12 : vector<1x128xf32> to vector<8x128xf32>
    %25 = arith.addf %23, %24 : vector<8x128xf32>
    %26 = vector.extract_strided_slice %25 {offsets = [0, 0], sizes = [8, 4], strides = [1, 1]} : vector<8x128xf32> to vector<8x4xf32>
    %c0_20 = arith.constant 0 : index
    %c0_21 = arith.constant 0 : index
    %27 = vector.load %arg3[%c0_20, %c0_21] : memref<8x4xf32, #tpu.memory_space<vmem>>, vector<8x4xf32>
    tpu.vector_store %arg3[%c0_20, %c0_21], %26 {strides = array<i32>} : memref<8x4xf32, #tpu.memory_space<vmem>>, vector<8x4xf32>,
    return
  }
  func.func @transform_0(%arg0: i32) -> (i32, i32) {
    %c0_i32 = arith.constant 0 : i32
    %c0_i32_0 = arith.constant 0 : i32
    return %arg0, %c0_i32 : i32, i32
  }
  func.func @transform_1(%arg0: i32) -> (i32, i32, i32) {
    %c0_i32 = arith.constant 0 : i32
    %c0_i32_0 = arith.constant 0 : i32
    %c0_i32_1 = arith.constant 0 : i32
    %c0_i32_2 = arith.constant 0 : i32
    return %c0_i32, %c0_i32_0, %c0_i32_1 : i32, i32, i32
  }
  func.func @transform_2(%arg0: i32) -> (i32, i32) {
    %c0_i32 = arith.constant 0 : i32
    %c0_i32_0 = arith.constant 0 : i32
    return %arg0, %c0_i32 : i32, i32
  }
}

</mosaic_0001>

<bundles_post_ra>
// kernel: tpu_custom_call.1
= control target key start
LH: loop header
LB: loop body
LE: loop exit
PB: predicated region body
PF: predicated region fallthrough
CT: control target
= control target key end

     0   :  { %7 = vsyncpa [#allocation3], 0  ;;  %s613_s0 = inlined_call_operand.hbm [shape: f32[8,16], index: 0, kind: input, shape index: {}]   ;;  %s614_s1 = inlined_call_operand.hbm [shape: f32[3,136,128], index: 1, kind: input, shape index: {}]   ;;  %s615_s2 = inlined_call_operand.vmem [shape: f32[8,4], index: 2, kind: output, shape index: {}]  }
   0x1   :  { %8 = vsyncpa [#allocation5], 0  ;;  %s537_s9 = smov [#allocation2]   ;;  %s538_s11 = smov [#allocation4]  }
   0x2   :  { %s15_s10 = sshll.u32 %s537_s9, 4  ;;  %s24_s12 = sshll.u32 %s538_s11, 4  ;;  %s16_s10 = int_to_ptr.vmem [resolvable:$true] %s15_s10  ;;  %s559_s12 = int_to_ptr.vmem [resolvable:$true] %s24_s12 }
   0x3   :  { %s489_s15 = scalar_lea.hbm %s613_s0, 128 }
   0x4   :  { %p490_p0 = scmp.ne.s32.totalorder %s613_s0, %s489_s15  ;;  %p493_p1 = scmp.lt.u32.totalorder %s489_s15, %s613_s0 }
   0x6   :  { %p495_p2 = pnand %p493_p1, %p490_p0 }
   0x8   :  { %498 = shalt.err (!%p495_p2)
}
   0x9   :  { %s499_s20 = scalar_lea.vmem %s16_s10, 128  ;;  %p504_p4 = scmp.lt.s32.totalorder %s16_s10, %s16_s10 }
   0xa   :  { %p500_p3 = scmp.ne.s32.totalorder %s16_s10, %s499_s20  ;;  %p505_p5 = scmp.lt.s32.totalorder %s499_s20, %s499_s20 }
   0xc   :  { %p506_p6 = por %p505_p5, %p504_p4 }
   0xe   :  { %p507_p7 = pnand %p506_p6, %p500_p3 }
  0x10   :  { %510 = shalt.err (!%p507_p7)
}
  0x11   :  { %18 = dma.hbm_to_vmem [thread:$0]  %s613_s0, 128, %s16_s10, [#allocation3]  }
  0x12   :  { %s511_s25 = scalar_lea.hbm %s614_s1, 6528 }
  0x13   :  { %p512_p8 = scmp.ne.s32.totalorder %s614_s1, %s511_s25  ;;  %p515_p9 = scmp.lt.u32.totalorder %s511_s25, %s614_s1 }
  0x15   :  { %p517_p10 = pnand %p515_p9, %p512_p8 }
  0x17   :  { %520 = shalt.err (!%p517_p10)
}
  0x18   :  { %s521_s30 = scalar_lea.vmem %s559_s12, 6528  ;;  %p526_p12 = scmp.lt.s32.totalorder %s559_s12, %s559_s12 }
  0x19   :  { %p522_p11 = scmp.ne.s32.totalorder %s559_s12, %s521_s30  ;;  %p527_p13 = scmp.lt.s32.totalorder %s521_s30, %s521_s30 }
  0x1b   :  { %p528_p0 = por %p527_p13, %p526_p12 }
  0x1d   :  { %p529_p1 = pnand %p528_p0, %p522_p11 }
  0x1f   :  { %532 = shalt.err (!%p529_p1)
}
  0x20   :  { %s539_s0 = smov 128   ;;  %s540_s3 = smov 8  }
  0x21   :  { %30 = dma.hbm_to_vmem [thread:$0]  %s614_s1, 6528, %s559_s12, [#allocation5], %s539_s0, %s539_s0, %s540_s3  }
  0x22   :  { %533 = dma.done.wait [#allocation3], 128  }
  0x23   :  { %534 = vsyncadd [#allocation3], 4294967168 }
  0x24   :  { %535 = dma.done.wait [#allocation5], 6528  }
  0x25   :  { %536 = vsyncadd [#allocation5], 4294960768  ;;  %v541_v0 = vmov 0.0|0.0   ;;  %vm542_vm0 = vmmov 0   ;;  %v543_v1 = vmov 0.0   ;;  %v38_v2 = vld [vmem:[#allocation4] sm:$0xff] }
  0x26   :  { %431 = vmatprep.subr.bf16.mxu0 %v541_v0  ;;  %358 = vmatprep.mubr.msk.f32.mxu0 %vm542_vm0, %v543_v1  ;;  %v39_v3 = vld [vmem:[#allocation4 + $0x8] sm:$0xff]  ;;  %v42_v6 = vld [vmem:[#allocation4 + $0x90] sm:$0xff]  ;;  %v43_v7 = vld [vmem:[#allocation4 + $0x98] sm:$0xff]  ;;  %vm81_vm1 = vcmask 130048   ;;  %vm305_vm2 = vcmask 31744  }
  0x27   :  { %434 = vmatprep.subr.bf16.mxu1 %v541_v0  ;;  %393 = vmatprep.mubr.msk.f32.mxu1 %vm542_vm0, %v543_v1  ;;  %v432_v4 = vpack.c.bf16 %v39_v3, %v38_v2  ;;  %v41_v5 = vld [vmem:[#allocation4 + $0x88] sm:$0xff]  ;;  %v44_v9 = vld [vmem:[#allocation4 + $0xa0] sm:$0xff]  ;;  %v37_v10 = vld [vmem:[#allocation2] sm:$0xff] }
  0x28   :  { %v435_v8 = vpack.c.bf16 %v42_v6, %v41_v5  ;;  %v438_v11 = vpack.c.bf16 %v44_v9, %v43_v7  ;;  %v45_v12 = vld [vmem:[#allocation4 + $0xa8] sm:$0xff]  ;;  %v46_v13 = vld [vmem:[#allocation4 + $0xb0] sm:$0xff]  ;;  %v47_v15 = vld [vmem:[#allocation4 + $0xb8] sm:$0xff] }
  0x29   :  { %433 = vmatpush3.bf16.msra.mxu0 %v432_v4  ;;  %v441_v14 = vpack.c.bf16 %v46_v13, %v45_v12  ;;  %v48_v16 = vld [vmem:[#allocation4 + $0xc0] sm:$0xff]  ;;  %v49_v18 = vld [vmem:[#allocation4 + $0xc8] sm:$0xff]  ;;  %v50_v19 = vld [vmem:[#allocation4 + $0xd0] sm:$0xff] }
  0x2a   :  { %436 = vmatpush3.bf16.msra.mxu1 %v435_v8  ;;  %458 = vmatprep.subr.bf16.mxu0 %v541_v0  ;;  %v444_v17 = vpack.c.bf16 %v48_v16, %v47_v15  ;;  %v447_v20 = vpack.c.bf16 %v50_v19, %v49_v18  ;;  %v51_v21 = vld [vmem:[#allocation4 + $0xd8] sm:$0xff]  ;;  %v52_v22 = vld [vmem:[#allocation4 + $0xe0] sm:$0xff]  ;;  %v53_v24 = vld [vmem:[#allocation4 + $0xe8] sm:$0xff] }
  0x2b   :  { %437 = vmatprep.subr.bf16.mxu1 %v541_v0  ;;  %v450_v23 = vpack.c.bf16 %v52_v22, %v51_v21  ;;  %v54_v25 = vld [vmem:[#allocation4 + $0xf0] sm:$0xff]  ;;  %v55_v27 = vld [vmem:[#allocation4 + $0xf8] sm:$0xff]  ;;  %v56_v28 = vld [vmem:[#allocation4 + $0x100] sm:$0xff] }
  0x2c   :  { %359 = vmatmul.mubr.msk.f32.vlgmr.msra.gmra.mrb[0].mxu0 %vm81_vm1, %v37_v10  ;;  %v453_v26 = vpack.c.bf16 %v54_v25, %v53_v24  ;;  %v456_v29 = vpack.c.bf16 %v56_v28, %v55_v27  ;;  %v58_v30 = vld [vmem:[#allocation4 + $0x110] sm:$0xff]  ;;  %v59_v31 = vld [vmem:[#allocation4 + $0x118] sm:$0xff]  ;;  %v60_v32 = vld [vmem:[#allocation4 + $0x120] sm:$0xff] }
  0x2d   :  { %428 = vmatprep.mubr.msk.f32.mxu0 %vm542_vm0, %v543_v1  ;;  %v459_v33 = vpack.c.bf16 %v59_v31, %v58_v30  ;;  %v61_v34 = vld [vmem:[#allocation4 + $0x128] sm:$0xff]  ;;  %v62_v36 = vld [vmem:[#allocation4 + $0x130] sm:$0xff]  ;;  %v63_v37 = vld [vmem:[#allocation4 + $0x138] sm:$0xff] }
  0x2e   :  { %439 = vmatpush3.bf16.msra.mxu1 %v438_v11  ;;  %v462_v35 = vpack.c.bf16 %v61_v34, %v60_v32  ;;  %v465_v38 = vpack.c.bf16 %v63_v37, %v62_v36  ;;  %v64_v39 = vld [vmem:[#allocation4 + $0x140] sm:$0xff]  ;;  %v65_v40 = vld [vmem:[#allocation4 + $0x148] sm:$0xff]  ;;  %v66_v42 = vld [vmem:[#allocation4 + $0x150] sm:$0xff] }
  0x2f   :  { %440 = vmatprep.subr.bf16.mxu1 %v541_v0  ;;  %460 = vmatpush3.bf16.msra.mxu0 %v459_v33  ;;  %v468_v41 = vpack.c.bf16 %v65_v40, %v64_v39  ;;  %v67_v43 = vld [vmem:[#allocation4 + $0x158] sm:$0xff]  ;;  %v68_v45 = vld [vmem:[#allocation4 + $0x160] sm:$0xff]  ;;  %v69_v46 = vld [vmem:[#allocation4 + $0x168] sm:$0xff] }
  0x30   :  { %461 = vmatprep.subr.bf16.mxu0 %v541_v0  ;;  %v471_v44 = vpack.c.bf16 %v67_v43, %v66_v42  ;;  %v474_v47 = vpack.c.bf16 %v69_v46, %v68_v45  ;;  %v70_v48 = vld [vmem:[#allocation4 + $0x170] sm:$0xff]  ;;  %v71_v49 = vld [vmem:[#allocation4 + $0x178] sm:$0xff]  ;;  %v313_v51 = vld [vmem:[#allocation4 + $0x80] ss:$0 sm:$0xff] }
  0x31   :  { %v477_v50 = vpack.c.bf16 %v71_v49, %v70_v48  ;;  %v72_v56 = vld [vmem:[#allocation4 + $0x180] sm:$0xff]  ;;  %v73_v57 = vld [vmem:[#allocation4 + $0x188] sm:$0xff]  ;;  %v316_v1 = vld [vmem:[#allocation4 + $0x190] ss:$0 sm:$0xff] }
  0x32   :  { %442 = vmatpush3.bf16.msra.mxu1 %v441_v14  ;;  %v480_v58 = vpack.c.bf16 %v73_v57, %v72_v56  ;;  %v315_v59 = vld [vmem:[#allocation4 + $0x108] ss:$0 sm:$0xff] }
  0x33   :  { %443 = vmatprep.subr.bf16.mxu1 %v541_v0  ;;  %463 = vmatpush3.bf16.msra.mxu0 %v462_v35 }
  0x34   :  { %464 = vmatprep.subr.bf16.mxu0 %v541_v0 }
  0x36   :  { %445 = vmatpush3.bf16.msra.mxu1 %v444_v17 }
  0x37   :  { %446 = vmatprep.subr.bf16.mxu1 %v541_v0  ;;  %466 = vmatpush3.bf16.msra.mxu0 %v465_v38 }
  0x38   :  { %467 = vmatprep.subr.bf16.mxu0 %v541_v0 }
  0x3a   :  { %448 = vmatpush3.bf16.msra.mxu1 %v447_v20 }
  0x3b   :  { %449 = vmatprep.subr.bf16.mxu1 %v541_v0  ;;  %469 = vmatpush3.bf16.msra.mxu0 %v468_v41 }
  0x3c   :  { %470 = vmatprep.subr.bf16.mxu0 %v541_v0 }
  0x3e   :  { %451 = vmatpush3.bf16.msra.mxu1 %v450_v23 }
  0x3f   :  { %452 = vmatprep.subr.bf16.mxu1 %v541_v0  ;;  %472 = vmatpush3.bf16.msra.mxu0 %v471_v44 }
  0x40   :  { %473 = vmatprep.subr.bf16.mxu0 %v541_v0 }
  0x42   :  { %454 = vmatpush3.bf16.msra.mxu1 %v453_v26 }
  0x43   :  { %455 = vmatprep.subr.bf16.mxu1 %v541_v0  ;;  %475 = vmatpush3.bf16.msra.mxu0 %v474_v47 }
  0x44   :  { %476 = vmatprep.subr.bf16.mxu0 %v541_v0 }
  0x46   :  { %457 = vmatpush3.bf16.msra.mxu1 %v456_v29 }
  0x47   :  { %478 = vmatpush3.bf16.msra.mxu0 %v477_v50 }
  0x48   :  { %479 = vmatprep.subr.bf16.mxu0 %v541_v0 }
  0x4b   :  { %481 = vmatpush3.bf16.msra.mxu0 %v480_v58 }
  0xff   :  { %v151_v52 = vpop.f32.mrb[0].mxu0 }
 0x100   :  { %v152_v53 = vadd.f32 %v313_v51, %v151_v52  ;;  %v360_v54 = vpop.f32.mrb[1].mxu0 }
 0x102   :  { %v155_v55 = vmax.f32 %v152_v53, 0.0 }
 0x104   :  { %394 = vmatmul.mubr.f32.vlgmr.msra.gmra.mrb[0].mxu1 %v155_v55 }
 0x1d7   :  { %v226_v60 = vpop.f32.mrb[0].mxu1 }
 0x1d8   :  { %v227_v61 = vadd.f32 %v315_v59, %v226_v60  ;;  %v395_v62 = vpop.f32.mrb[1].mxu1 }
 0x1da   :  { %v230_v63 = vmax.f32 %v227_v61, 0.0 }
 0x1dc   :  { %429 = vmatmul.mubr.f32.vlgmr.msra.gmra.mrb[2].mxu0 %v230_v63 }
 0x2af   :  { %v301_v2 = vpop.f32.mrb[2].mxu0 }
 0x2b0   :  { %v302_v0 = vadd.f32 %v316_v1, %v301_v2  ;;  %v430_v3 = vpop.f32.mrb[3].mxu0 }
 0x2b2   :  { %306 = vst.msk [vmem:[%s615_s2] sm:$0xff] %vm305_vm2, %v302_v0 }
 0x2b3   :  { %311 = vsyncpa [#allocation3], 1 }
 0x2b4   :  { %312 = vsyncpa [#allocation5], 1 }

</bundles_post_ra>
